<compile_context>
chip_gen: v5e
topology: v5e:2x2
jax: 0.10.0
libtpu: 0.0.40
codegen_flags: <defaults>
</compile_context>

<pallas_src>
from functools import partial

import jax
import jax.numpy as jnp
from jax.experimental import pallas as pl
from jax.experimental.pallas import tpu as pltpu


def _safe_fused_kernel(xpad_ref, wmat_ref, mask_ref, gamma_ref, beta_ref,
                       w1_ref, b1_ref, w2_ref, b2_ref, out_ref,
                       xcol_s, pooled_s, *, N, Cin, Cout, H, W):
    Wp = W + 2                       # padded width
    HWp = H * Wp                     # per-sample flattened spatial extent (incl. junk cols)
    Lp = (H + 3) * Wp                # per-sample padded slab length (1 top + 2 bottom rows)
    M = (N - 1) * Lp + HWp           # im2col / conv-output column count (whole batch)

    # ---- im2col: one full-width shifted lane-slice per tap (all samples at once) --------
    for t in range(9):
        dy, dx = t // 3, t % 3
        k = dy * Wp + dx
        xcol_s[t * Cin:(t + 1) * Cin, :] = xpad_ref[:, k:k + M]

    # ---- conv3x3: single batched matmul (bias dropped; cancels under training-mode BN) --
    y0 = jnp.dot(wmat_ref[...], xcol_s[...],
                 preferred_element_type=jnp.float32)        # (Cout, M)

    # ---- BatchNorm batch statistics over valid pixels only ------------------------------
    mask = mask_ref[...]                                    # (1, M): 1.0 on real pixels
    y0m = y0 * mask
    inv_cnt = 1.0 / float(N * H * W)
    mean = jnp.sum(y0m, axis=1, keepdims=True) * inv_cnt    # (Cout, 1)
    var = jnp.sum(y0m * y0, axis=1, keepdims=True) * inv_cnt - mean * mean
    scale = gamma_ref[...] * jax.lax.rsqrt(var + 1e-5)      # (Cout, 1)
    shift = beta_ref[...] - mean * scale

    # ---- BN + ReLU: one wide pass over the whole batch slab -----------------------------
    y = jnp.maximum(y0 * scale + shift, 0.0)                # (Cout, M)
    ym = y * mask

    # ---- SE squeeze (per-sample masked mean) + excite, batched over samples -------------
    inv_hw = 1.0 / float(H * W)
    for n in range(N):
        pooled_s[:, n:n + 1] = jnp.sum(ym[:, n * Lp:n * Lp + HWp],
                                       axis=1, keepdims=True) * inv_hw
    hid = jnp.maximum(
        jnp.dot(w1_ref[...], pooled_s[...],
                preferred_element_type=jnp.float32) + b1_ref[...], 0.0)   # (Cmid, N)
    se = jax.nn.sigmoid(
        jnp.dot(w2_ref[...], hid,
                preferred_element_type=jnp.float32) + b2_ref[...])        # (Cout, N)

    # ---- channel rescale; lane-dense full-width store per sample ------------------------
    for n in range(N):
        out_ref[n * Cout:(n + 1) * Cout, :] = y[:, n * Lp:n * Lp + HWp] * se[:, n:n + 1]


@jax.jit
def safe_forward(x_nchw, params):
    N, Cin, H, W = x_nchw.shape
    Cout = params["bn_g"].shape[0]
    Cmid = params["se_b1"].shape[0]
    Wp = W + 2
    HWp = H * Wp
    Lp = (H + 3) * Wp
    M = (N - 1) * Lp + HWp

    # ---- wrapper-side layout plumbing (tiny) ---------------------------------------------
    # padded, row-flattened slab with samples laid side by side along the lane axis
    xpad = jnp.pad(x_nchw.astype(jnp.float32), ((0, 0), (0, 0), (1, 2), (1, 1)))
    xpad = jnp.transpose(xpad, (1, 0, 2, 3)).reshape(Cin, N * Lp)          # (Cin, N*Lp)

    wmat = jnp.transpose(params["conv_w"], (0, 2, 3, 1)).reshape(Cout, 9 * Cin)
    wmat = wmat.astype(jnp.float32)                                        # (Cout, 9*Cin)
    q = jnp.arange(M) % Lp
    mask = ((q < HWp) & ((q % Wp) < W)).astype(jnp.float32).reshape(1, M)  # valid pixels
    gamma = params["bn_g"].reshape(Cout, 1).astype(jnp.float32)
    beta = params["bn_b"].reshape(Cout, 1).astype(jnp.float32)
    w1 = params["se_w1"][:, :, 0, 0].astype(jnp.float32)                   # (Cmid, Cout)
    b1 = params["se_b1"].reshape(Cmid, 1).astype(jnp.float32)
    w2 = params["se_w2"][:, :, 0, 0].astype(jnp.float32)                   # (Cout, Cmid)
    b2 = params["se_b2"].reshape(Cout, 1).astype(jnp.float32)

    out = pl.pallas_call(
        partial(_safe_fused_kernel, N=N, Cin=Cin, Cout=Cout, H=H, W=W),
        grid=(1,),
        in_specs=[
            pl.BlockSpec((Cin, N * Lp), lambda i: (0, 0)),
            pl.BlockSpec((Cout, 9 * Cin), lambda i: (0, 0)),
            pl.BlockSpec((1, M), lambda i: (0, 0)),
            pl.BlockSpec((Cout, 1), lambda i: (0, 0)),
            pl.BlockSpec((Cout, 1), lambda i: (0, 0)),
            pl.BlockSpec((Cmid, Cout), lambda i: (0, 0)),
            pl.BlockSpec((Cmid, 1), lambda i: (0, 0)),
            pl.BlockSpec((Cout, Cmid), lambda i: (0, 0)),
            pl.BlockSpec((Cout, 1), lambda i: (0, 0)),
        ],
        out_specs=pl.BlockSpec((N * Cout, HWp), lambda i: (0, 0)),
        out_shape=jax.ShapeDtypeStruct((N * Cout, HWp), jnp.float32),
        scratch_shapes=[
            pltpu.VMEM((9 * Cin, M), jnp.float32),   # im2col slab (whole batch)
            pltpu.VMEM((Cout, N), jnp.float32),      # per-sample SE pooled means
        ],
        compiler_params=pltpu.CompilerParams(dimension_semantics=("arbitrary",)),
    )(xpad, wmat, mask, gamma, beta, w1, b1, w2, b2)

    # strip the 2 junk columns per row -- free wrapper-side plumbing
    return out.reshape(N, Cout, H, Wp)[..., :W]


def init_params(key, in_ch, out_ch):
    """Deterministic PyTorch-shaped parameter init (kaiming-uniform-like bounds)."""
    ks = jax.random.split(key, 6)
    mid = out_ch // 4

    def u(k, shape, fan_in):
        bound = 1.0 / (fan_in ** 0.5)
        return jax.random.uniform(k, shape, jnp.float32, -bound, bound)

    return {
        "conv_w": u(ks[0], (out_ch, in_ch, 3, 3), in_ch * 9),
        "conv_b": u(ks[1], (out_ch,), in_ch * 9),
        "bn_g": jnp.ones((out_ch,), jnp.float32),
        "bn_b": jnp.zeros((out_ch,), jnp.float32),
        "se_w1": u(ks[2], (mid, out_ch, 1, 1), out_ch),
        "se_b1": u(ks[3], (mid,), out_ch),
        "se_w2": u(ks[4], (out_ch, mid, 1, 1), mid),
        "se_b2": u(ks[5], (out_ch,), mid),
    }


def reference(x, p):
    """Pure-JAX reference matching the PyTorch forward (training-mode BN, with conv bias)."""
    y0 = jax.lax.conv_general_dilated(
        x, p["conv_w"], (1, 1), ((1, 1), (1, 1)),
        dimension_numbers=("NCHW", "OIHW", "NCHW")) + p["conv_b"][None, :, None, None]
    mean = y0.mean(axis=(0, 2, 3), keepdims=True)
    var = y0.var(axis=(0, 2, 3), keepdims=True)
    y = (y0 - mean) * jax.lax.rsqrt(var + 1e-5)
    y = y * p["bn_g"][None, :, None, None] + p["bn_b"][None, :, None, None]
    y = jnp.maximum(y, 0.0)
    pooled = y.mean(axis=(2, 3))
    h = jnp.maximum(pooled @ p["se_w1"][:, :, 0, 0].T + p["se_b1"], 0.0)
    s = jax.nn.sigmoid(h @ p["se_w2"][:, :, 0, 0].T + p["se_b2"])
    return y * s[:, :, None, None]


if __name__ == "__main__":
    key = jax.random.PRNGKey(0)
    kx, kp = jax.random.split(key)
    N, Cin, Cout, H, W = 2, 4, 8, 16, 16

    x = jax.random.normal(kx, (N, Cin, H, W), jnp.float32)
    params = init_params(kp, Cin, Cout)

    out = jax.block_until_ready(safe_forward(x, params))
    ref = reference(x, params)

    assert out.shape == (N, Cout, H, W)
    err = float(jnp.max(jnp.abs(out - ref)))
    assert jnp.allclose(out, ref, atol=2e-3, rtol=2e-3), err
    print("KERNEL_OK")
</pallas_src>

<mosaic_0001>
module attributes {stable_mosaic.version = 11 : i64} {
  func.func @_safe_fused_kernel(%arg0: i32, %arg1: memref<4x684xf32, #tpu.memory_space<vmem>>, %arg2: memref<8x36xf32, #tpu.memory_space<vmem>>, %arg3: memref<1x630xf32, #tpu.memory_space<vmem>>, %arg4: memref<8x1xf32, #tpu.memory_space<vmem>>, %arg5: memref<8x1xf32, #tpu.memory_space<vmem>>, %arg6: memref<2x8xf32, #tpu.memory_space<vmem>>, %arg7: memref<2x1xf32, #tpu.memory_space<vmem>>, %arg8: memref<8x2xf32, #tpu.memory_space<vmem>>, %arg9: memref<8x1xf32, #tpu.memory_space<vmem>>, %arg10: memref<16x288xf32, #tpu.memory_space<vmem>>, %arg11: memref<36x630xf32, #tpu.memory_space<vmem>>, %arg12: memref<8x2xf32, #tpu.memory_space<vmem>>) attributes {dimension_semantics = [#tpu.dimension_semantics<arbitrary>], iteration_bounds = array<i64: 1>, scalar_prefetch = 0 : i64, scratch_operands = 2 : i64, tpu.core_type = #tpu.core_type<tc>, window_params = [{pipeline_mode = #tpu.pipeline_mode<synchronous>, transform_indices = @transform_0, window_bounds = array<i64: 4, 684>}, {pipeline_mode = #tpu.pipeline_mode<synchronous>, transform_indices = @transform_1, window_bounds = array<i64: 8, 36>}, {pipeline_mode = #tpu.pipeline_mode<synchronous>, transform_indices = @transform_2, window_bounds = array<i64: 1, 630>}, {pipeline_mode = #tpu.pipeline_mode<synchronous>, transform_indices = @transform_3, window_bounds = array<i64: 8, 1>}, {pipeline_mode = #tpu.pipeline_mode<synchronous>, transform_indices = @transform_4, window_bounds = array<i64: 8, 1>}, {pipeline_mode = #tpu.pipeline_mode<synchronous>, transform_indices = @transform_5, window_bounds = array<i64: 2, 8>}, {pipeline_mode = #tpu.pipeline_mode<synchronous>, transform_indices = @transform_6, window_bounds = array<i64: 2, 1>}, {pipeline_mode = #tpu.pipeline_mode<synchronous>, transform_indices = @transform_7, window_bounds = array<i64: 8, 2>}, {pipeline_mode = #tpu.pipeline_mode<synchronous>, transform_indices = @transform_8, window_bounds = array<i64: 8, 1>}, {pipeline_mode = #tpu.pipeline_mode<synchronous>, transform_indices = @transform_9, window_bounds = array<i64: 16, 288>}]} {
    %c0 = arith.constant 0 : index
    %c0_0 = arith.constant 0 : index
    %0 = vector.load %arg1[%c0, %c0_0] : memref<4x684xf32, #tpu.memory_space<vmem>>, vector<4x630xf32>
    %c0_1 = arith.constant 0 : index
    %c0_2 = arith.constant 0 : index
    %1 = vector.load %arg11[%c0_1, %c0_2] : memref<36x630xf32, #tpu.memory_space<vmem>>, vector<4x630xf32>
    tpu.vector_store %arg11[%c0_1, %c0_2], %0 {strides = array<i32>} : memref<36x630xf32, #tpu.memory_space<vmem>>, vector<4x630xf32>,
    %c0_3 = arith.constant 0 : index
    %c1 = arith.constant 1 : index
    %2 = vector.load %arg1[%c0_3, %c1] : memref<4x684xf32, #tpu.memory_space<vmem>>, vector<4x630xf32>
    %c4 = arith.constant 4 : index
    %c0_4 = arith.constant 0 : index
    %3 = vector.load %arg11[%c4, %c0_4] : memref<36x630xf32, #tpu.memory_space<vmem>>, vector<4x630xf32>
    tpu.vector_store %arg11[%c4, %c0_4], %2 {strides = array<i32>} : memref<36x630xf32, #tpu.memory_space<vmem>>, vector<4x630xf32>,
    %c0_5 = arith.constant 0 : index
    %c2 = arith.constant 2 : index
    %4 = vector.load %arg1[%c0_5, %c2] : memref<4x684xf32, #tpu.memory_space<vmem>>, vector<4x630xf32>
    %c8 = arith.constant 8 : index
    %c0_6 = arith.constant 0 : index
    %5 = vector.load %arg11[%c8, %c0_6] : memref<36x630xf32, #tpu.memory_space<vmem>>, vector<4x630xf32>
    tpu.vector_store %arg11[%c8, %c0_6], %4 {strides = array<i32>} : memref<36x630xf32, #tpu.memory_space<vmem>>, vector<4x630xf32>,
    %c0_7 = arith.constant 0 : index
    %c18 = arith.constant 18 : index
    %6 = vector.load %arg1[%c0_7, %c18] : memref<4x684xf32, #tpu.memory_space<vmem>>, vector<4x630xf32>
    %c12 = arith.constant 12 : index
    %c0_8 = arith.constant 0 : index
    %7 = vector.load %arg11[%c12, %c0_8] : memref<36x630xf32, #tpu.memory_space<vmem>>, vector<4x630xf32>
    tpu.vector_store %arg11[%c12, %c0_8], %6 {strides = array<i32>} : memref<36x630xf32, #tpu.memory_space<vmem>>, vector<4x630xf32>,
    %c0_9 = arith.constant 0 : index
    %c19 = arith.constant 19 : index
    %8 = vector.load %arg1[%c0_9, %c19] : memref<4x684xf32, #tpu.memory_space<vmem>>, vector<4x630xf32>
    %c16 = arith.constant 16 : index
    %c0_10 = arith.constant 0 : index
    %9 = vector.load %arg11[%c16, %c0_10] : memref<36x630xf32, #tpu.memory_space<vmem>>, vector<4x630xf32>
    tpu.vector_store %arg11[%c16, %c0_10], %8 {strides = array<i32>} : memref<36x630xf32, #tpu.memory_space<vmem>>, vector<4x630xf32>,
    %c0_11 = arith.constant 0 : index
    %c20 = arith.constant 20 : index
    %10 = vector.load %arg1[%c0_11, %c20] : memref<4x684xf32, #tpu.memory_space<vmem>>, vector<4x630xf32>
    %c20_12 = arith.constant 20 : index
    %c0_13 = arith.constant 0 : index
    %11 = vector.load %arg11[%c20_12, %c0_13] : memref<36x630xf32, #tpu.memory_space<vmem>>, vector<4x630xf32>
    tpu.vector_store %arg11[%c20_12, %c0_13], %10 {strides = array<i32>} : memref<36x630xf32, #tpu.memory_space<vmem>>, vector<4x630xf32>,
    %c0_14 = arith.constant 0 : index
    %c36 = arith.constant 36 : index
    %12 = vector.load %arg1[%c0_14, %c36] : memref<4x684xf32, #tpu.memory_space<vmem>>, vector<4x630xf32>
    %c24 = arith.constant 24 : index
    %c0_15 = arith.constant 0 : index
    %13 = vector.load %arg11[%c24, %c0_15] : memref<36x630xf32, #tpu.memory_space<vmem>>, vector<4x630xf32>
    tpu.vector_store %arg11[%c24, %c0_15], %12 {strides = array<i32>} : memref<36x630xf32, #tpu.memory_space<vmem>>, vector<4x630xf32>,
    %c0_16 = arith.constant 0 : index
    %c37 = arith.constant 37 : index
    %14 = vector.load %arg1[%c0_16, %c37] : memref<4x684xf32, #tpu.memory_space<vmem>>, vector<4x630xf32>
    %c28 = arith.constant 28 : index
    %c0_17 = arith.constant 0 : index
    %15 = vector.load %arg11[%c28, %c0_17] : memref<36x630xf32, #tpu.memory_space<vmem>>, vector<4x630xf32>
    tpu.vector_store %arg11[%c28, %c0_17], %14 {strides = array<i32>} : memref<36x630xf32, #tpu.memory_space<vmem>>, vector<4x630xf32>,
    %c0_18 = arith.constant 0 : index
    %c38 = arith.constant 38 : index
    %16 = vector.load %arg1[%c0_18, %c38] : memref<4x684xf32, #tpu.memory_space<vmem>>, vector<4x630xf32>
    %c32 = arith.constant 32 : index
    %c0_19 = arith.constant 0 : index
    %17 = vector.load %arg11[%c32, %c0_19] : memref<36x630xf32, #tpu.memory_space<vmem>>, vector<4x630xf32>
    tpu.vector_store %arg11[%c32, %c0_19], %16 {strides = array<i32>} : memref<36x630xf32, #tpu.memory_space<vmem>>, vector<4x630xf32>,
    %c0_20 = arith.constant 0 : index
    %c0_21 = arith.constant 0 : index
    %18 = vector.load %arg2[%c0_20, %c0_21] : memref<8x36xf32, #tpu.memory_space<vmem>>, vector<8x36xf32>
    %c0_22 = arith.constant 0 : index
    %c0_23 = arith.constant 0 : index
    %19 = vector.load %arg11[%c0_22, %c0_23] : memref<36x630xf32, #tpu.memory_space<vmem>>, vector<36x630xf32>
    %cst = arith.constant dense<0.000000e+00> : vector<8x630xf32>
    %20 = tpu.matmul %18, %19, %cst {dimension_numbers = #tpu.dot_dimension_numbers<[1], [0], [0], [1], [0, 0, 1, 1], [], []>} : vector<8x36xf32>, vector<36x630xf32>, vector<8x630xf32> -> vector<8x630xf32>
    %c0_24 = arith.constant 0 : index
    %c0_25 = arith.constant 0 : index
    %21 = vector.load %arg3[%c0_24, %c0_25] : memref<1x630xf32, #tpu.memory_space<vmem>>, vector<1x630xf32>
    %22 = vector.broadcast %21 : vector<1x630xf32> to vector<8x630xf32>
    %23 = arith.mulf %20, %22 : vector<8x630xf32>
    %cst_26 = arith.constant dense<0.000000e+00> : vector<8xf32>
    %24 = vector.multi_reduction <add>, %23, %cst_26 [1] : vector<8x630xf32> to vector<8xf32>
    %25 = vector.shape_cast %24 : vector<8xf32> to vector<8x1xf32>
    %cst_27 = arith.constant 0.001953125 : f32
    %26 = vector.broadcast %cst_27 : f32 to vector<8x1xf32>
    %27 = arith.mulf %25, %26 : vector<8x1xf32>
    %28 = arith.mulf %23, %20 : vector<8x630xf32>
    %cst_28 = arith.constant dense<0.000000e+00> : vector<8xf32>
    %29 = vector.multi_reduction <add>, %28, %cst_28 [1] : vector<8x630xf32> to vector<8xf32>
    %30 = vector.shape_cast %29 : vector<8xf32> to vector<8x1xf32>
    %cst_29 = arith.constant 0.001953125 : f32
    %31 = vector.broadcast %cst_29 : f32 to vector<8x1xf32>
    %32 = arith.mulf %30, %31 : vector<8x1xf32>
    %33 = arith.mulf %27, %27 : vector<8x1xf32>
    %34 = arith.subf %32, %33 : vector<8x1xf32>
    %c0_30 = arith.constant 0 : index
    %c0_31 = arith.constant 0 : index
    %35 = vector.load %arg4[%c0_30, %c0_31] : memref<8x1xf32, #tpu.memory_space<vmem>>, vector<8x1xf32>
    %cst_32 = arith.constant 9.99999974E-6 : f32
    %36 = vector.broadcast %cst_32 : f32 to vector<8x1xf32>
    %37 = arith.addf %34, %36 : vector<8x1xf32>
    %38 = math.rsqrt %37 : vector<8x1xf32>
    %39 = arith.mulf %35, %38 : vector<8x1xf32>
    %c0_33 = arith.constant 0 : index
    %c0_34 = arith.constant 0 : index
    %40 = vector.load %arg5[%c0_33, %c0_34] : memref<8x1xf32, #tpu.memory_space<vmem>>, vector<8x1xf32>
    %41 = arith.mulf %27, %39 : vector<8x1xf32>
    %42 = arith.subf %40, %41 : vector<8x1xf32>
    %43 = vector.broadcast %39 : vector<8x1xf32> to vector<8x630xf32>
    %44 = arith.mulf %20, %43 : vector<8x630xf32>
    %45 = vector.broadcast %42 : vector<8x1xf32> to vector<8x630xf32>
    %46 = arith.addf %44, %45 : vector<8x630xf32>
    %cst_35 = arith.constant 0.000000e+00 : f32
    %47 = vector.broadcast %cst_35 : f32 to vector<8x630xf32>
    %48 = arith.maximumf %46, %47 : vector<8x630xf32>
    %49 = vector.broadcast %21 : vector<1x630xf32> to vector<8x630xf32>
    %50 = arith.mulf %48, %49 : vector<8x630xf32>
    %51 = vector.extract_strided_slice %50 {offsets = [0, 0], sizes = [8, 288], strides = [1, 1]} : vector<8x630xf32> to vector<8x288xf32>
    %cst_36 = arith.constant dense<0.000000e+00> : vector<8xf32>
    %52 = vector.multi_reduction <add>, %51, %cst_36 [1] : vector<8x288xf32> to vector<8xf32>
    %53 = vector.shape_cast %52 : vector<8xf32> to vector<8x1xf32>
    %cst_37 = arith.constant 3.906250e-03 : f32
    %54 = vector.broadcast %cst_37 : f32 to vector<8x1xf32>
    %55 = arith.mulf %53, %54 : vector<8x1xf32>
    %c0_38 = arith.constant 0 : index
    %c0_39 = arith.constant 0 : index
    %56 = vector.load %arg12[%c0_38, %c0_39] : memref<8x2xf32, #tpu.memory_space<vmem>>, vector<8x1xf32>
    tpu.vector_store %arg12[%c0_38, %c0_39], %55 {strides = array<i32>} : memref<8x2xf32, #tpu.memory_space<vmem>>, vector<8x1xf32>,
    %57 = vector.extract_strided_slice %50 {offsets = [0, 342], sizes = [8, 288], strides = [1, 1]} : vector<8x630xf32> to vector<8x288xf32>
    %cst_40 = arith.constant dense<0.000000e+00> : vector<8xf32>
    %58 = vector.multi_reduction <add>, %57, %cst_40 [1] : vector<8x288xf32> to vector<8xf32>
    %59 = vector.shape_cast %58 : vector<8xf32> to vector<8x1xf32>
    %cst_41 = arith.constant 3.906250e-03 : f32
    %60 = vector.broadcast %cst_41 : f32 to vector<8x1xf32>
    %61 = arith.mulf %59, %60 : vector<8x1xf32>
    %c0_42 = arith.constant 0 : index
    %c1_43 = arith.constant 1 : index
    %62 = vector.load %arg12[%c0_42, %c1_43] : memref<8x2xf32, #tpu.memory_space<vmem>>, vector<8x1xf32>
    tpu.vector_store %arg12[%c0_42, %c1_43], %61 {strides = array<i32>} : memref<8x2xf32, #tpu.memory_space<vmem>>, vector<8x1xf32>,
    %c0_44 = arith.constant 0 : index
    %c0_45 = arith.constant 0 : index
    %63 = vector.load %arg6[%c0_44, %c0_45] : memref<2x8xf32, #tpu.memory_space<vmem>>, vector<2x8xf32>
    %c0_46 = arith.constant 0 : index
    %c0_47 = arith.constant 0 : index
    %64 = vector.load %arg12[%c0_46, %c0_47] : memref<8x2xf32, #tpu.memory_space<vmem>>, vector<8x2xf32>
    %cst_48 = arith.constant dense<0.000000e+00> : vector<2x2xf32>
    %65 = tpu.matmul %63, %64, %cst_48 {dimension_numbers = #tpu.dot_dimension_numbers<[1], [0], [0], [1], [0, 0, 1, 1], [], []>} : vector<2x8xf32>, vector<8x2xf32>, vector<2x2xf32> -> vector<2x2xf32>
    %c0_49 = arith.constant 0 : index
    %c0_50 = arith.constant 0 : index
    %66 = vector.load %arg7[%c0_49, %c0_50] : memref<2x1xf32, #tpu.memory_space<vmem>>, vector<2x1xf32>
    %67 = vector.broadcast %66 : vector<2x1xf32> to vector<2x2xf32>
    %68 = arith.addf %65, %67 : vector<2x2xf32>
    %cst_51 = arith.constant 0.000000e+00 : f32
    %69 = vector.broadcast %cst_51 : f32 to vector<2x2xf32>
    %70 = arith.maximumf %68, %69 : vector<2x2xf32>
    %c0_52 = arith.constant 0 : index
    %c0_53 = arith.constant 0 : index
    %71 = vector.load %arg8[%c0_52, %c0_53] : memref<8x2xf32, #tpu.memory_space<vmem>>, vector<8x2xf32>
    %cst_54 = arith.constant dense<0.000000e+00> : vector<8x2xf32>
    %72 = tpu.matmul %71, %70, %cst_54 {dimension_numbers = #tpu.dot_dimension_numbers<[1], [0], [0], [1], [0, 0, 1, 1], [], []>} : vector<8x2xf32>, vector<2x2xf32>, vector<8x2xf32> -> vector<8x2xf32>
    %c0_55 = arith.constant 0 : index
    %c0_56 = arith.constant 0 : index
    %73 = vector.load %arg9[%c0_55, %c0_56] : memref<8x1xf32, #tpu.memory_space<vmem>>, vector<8x1xf32>
    %74 = vector.broadcast %73 : vector<8x1xf32> to vector<8x2xf32>
    %75 = arith.addf %72, %74 : vector<8x2xf32>
    %76 = arith.negf %75 : vector<8x2xf32>
    %77 = math.exp %76 : vector<8x2xf32>
    %cst_57 = arith.constant 1.000000e+00 : f32
    %78 = vector.broadcast %cst_57 : f32 to vector<8x2xf32>
    %79 = arith.addf %78, %77 : vector<8x2xf32>
    %80 = arith.divf %78, %79 : vector<8x2xf32>
    %81 = vector.extract_strided_slice %48 {offsets = [0, 0], sizes = [8, 288], strides = [1, 1]} : vector<8x630xf32> to vector<8x288xf32>
    %82 = vector.extract_strided_slice %80 {offsets = [0, 0], sizes = [8, 1], strides = [1, 1]} : vector<8x2xf32> to vector<8x1xf32>
    %83 = vector.broadcast %82 : vector<8x1xf32> to vector<8x288xf32>
    %84 = arith.mulf %81, %83 : vector<8x288xf32>
    %c0_58 = arith.constant 0 : index
    %c0_59 = arith.constant 0 : index
    %85 = vector.load %arg10[%c0_58, %c0_59] : memref<16x288xf32, #tpu.memory_space<vmem>>, vector<8x288xf32>
    tpu.vector_store %arg10[%c0_58, %c0_59], %84 {strides = array<i32>} : memref<16x288xf32, #tpu.memory_space<vmem>>, vector<8x288xf32>,
    %86 = vector.extract_strided_slice %48 {offsets = [0, 342], sizes = [8, 288], strides = [1, 1]} : vector<8x630xf32> to vector<8x288xf32>
    %87 = vector.extract_strided_slice %80 {offsets = [0, 1], sizes = [8, 1], strides = [1, 1]} : vector<8x2xf32> to vector<8x1xf32>
    %88 = vector.broadcast %87 : vector<8x1xf32> to vector<8x288xf32>
    %89 = arith.mulf %86, %88 : vector<8x288xf32>
    %c8_60 = arith.constant 8 : index
    %c0_61 = arith.constant 0 : index
    %90 = vector.load %arg10[%c8_60, %c0_61] : memref<16x288xf32, #tpu.memory_space<vmem>>, vector<8x288xf32>
    tpu.vector_store %arg10[%c8_60, %c0_61], %89 {strides = array<i32>} : memref<16x288xf32, #tpu.memory_space<vmem>>, vector<8x288xf32>,
    return
  }
  func.func @transform_0(%arg0: i32) -> (i32, i32) {
    %c0_i32 = arith.constant 0 : i32
    %c0_i32_0 = arith.constant 0 : i32
    %c0_i32_1 = arith.constant 0 : i32
    return %c0_i32, %c0_i32_0 : i32, i32
  }
  func.func @transform_1(%arg0: i32) -> (i32, i32) {
    %c0_i32 = arith.constant 0 : i32
    %c0_i32_0 = arith.constant 0 : i32
    %c0_i32_1 = arith.constant 0 : i32
    return %c0_i32, %c0_i32_0 : i32, i32
  }
  func.func @transform_2(%arg0: i32) -> (i32, i32) {
    %c0_i32 = arith.constant 0 : i32
    %c0_i32_0 = arith.constant 0 : i32
    %c0_i32_1 = arith.constant 0 : i32
    return %c0_i32, %c0_i32_0 : i32, i32
  }
  func.func @transform_3(%arg0: i32) -> (i32, i32) {
    %c0_i32 = arith.constant 0 : i32
    %c0_i32_0 = arith.constant 0 : i32
    %c0_i32_1 = arith.constant 0 : i32
    return %c0_i32, %c0_i32_0 : i32, i32
  }
  func.func @transform_4(%arg0: i32) -> (i32, i32) {
    %c0_i32 = arith.constant 0 : i32
    %c0_i32_0 = arith.constant 0 : i32
    %c0_i32_1 = arith.constant 0 : i32
    return %c0_i32, %c0_i32_0 : i32, i32
  }
  func.func @transform_5(%arg0: i32) -> (i32, i32) {
    %c0_i32 = arith.constant 0 : i32
    %c0_i32_0 = arith.constant 0 : i32
    %c0_i32_1 = arith.constant 0 : i32
    return %c0_i32, %c0_i32_0 : i32, i32
  }
  func.func @transform_6(%arg0: i32) -> (i32, i32) {
    %c0_i32 = arith.constant 0 : i32
    %c0_i32_0 = arith.constant 0 : i32
    %c0_i32_1 = arith.constant 0 : i32
    return %c0_i32, %c0_i32_0 : i32, i32
  }
  func.func @transform_7(%arg0: i32) -> (i32, i32) {
    %c0_i32 = arith.constant 0 : i32
    %c0_i32_0 = arith.constant 0 : i32
    %c0_i32_1 = arith.constant 0 : i32
    return %c0_i32, %c0_i32_0 : i32, i32
  }
  func.func @transform_8(%arg0: i32) -> (i32, i32) {
    %c0_i32 = arith.constant 0 : i32
    %c0_i32_0 = arith.constant 0 : i32
    %c0_i32_1 = arith.constant 0 : i32
    return %c0_i32, %c0_i32_0 : i32, i32
  }
  func.func @transform_9(%arg0: i32) -> (i32, i32) {
    %c0_i32 = arith.constant 0 : i32
    %c0_i32_0 = arith.constant 0 : i32
    %c0_i32_1 = arith.constant 0 : i32
    return %c0_i32, %c0_i32_0 : i32, i32
  }
}

</mosaic_0001>

<bundles_post_ra>
// kernel: safe_forward.1
= control target key start
LH: loop header
LB: loop body
LE: loop exit
PB: predicated region body
PF: predicated region fallthrough
CT: control target
= control target key end

     0   :  { %s843_s19 = smov 126   ;;  %s844_s22 = smov 110   ;;  %vm128_vm0 = vcmask 1031168   ;;  %vm173_vm1 = vcmask 900096   ;;  %vm218_vm2 = vcmask 891904   ;;  %vm309_vm3 = vcmask 752640   ;;  %s1249_s0 = inlined_call_operand.vmem [shape: f32[4,684], index: 0, kind: input, shape index: {}]   ;;  %s1250_s1 = inlined_call_operand.vmem [shape: f32[8,36], index: 1, kind: input, shape index: {}]   ;;  %s1251_s2 = inlined_call_operand.vmem [shape: f32[1,630], index: 2, kind: input, shape index: {}]   ;;  %s1252_s3 = inlined_call_operand.vmem [shape: f32[8,1], index: 3, kind: input, shape index: {}]   ;;  %s1253_s4 = inlined_call_operand.vmem [shape: f32[8,1], index: 4, kind: input, shape index: {}]   ;;  %s1254_s6 = inlined_call_operand.vmem [shape: f32[2,1], index: 6, kind: input, shape index: {}]   ;;  %s1255_s5 = inlined_call_operand.vmem [shape: f32[2,8], index: 5, kind: input, shape index: {}]   ;;  %s1256_s8 = inlined_call_operand.vmem [shape: f32[8,1], index: 8, kind: input, shape index: {}]   ;;  %s1257_s7 = inlined_call_operand.vmem [shape: f32[8,2], index: 7, kind: input, shape index: {}]   ;;  %s1258_s9 = inlined_call_operand.vmem [shape: f32[16,288], index: 9, kind: output, shape index: {}]  }
   0x1   :  { %v907_v0 = vld [vmem:[%s1249_s0 + $0x8] sm:$0xff]  ;;  %v912_v1 = vld [vmem:[%s1249_s0] sm:$0xff]  ;;  %v34_v2 = vld [vmem:[%s1249_s0 + $0x10] sm:$0xf]  ;;  %s846_s23 = smov 108   ;;  %s847_s24 = smov 92  }
   0x2   :  { %40 = vst [vmem:[#allocation1 + $0x10] ss:$2 sm:$0xff] %v907_v0  ;;  %v61_v7 = vld [vmem:[%s1249_s0 + $0x10] sm:$0xf]  ;;  %s848_s25 = smov 91   ;;  %s849_s26 = smov 90  }
   0x3   :  { %38 = vst [vmem:[#allocation1] ss:$2 sm:$0xff] %v912_v1  ;;  %v104_v13 = vld [vmem:[%s1249_s0 + $0x10] sm:$0xf]  ;;  %s850_s27 = smov 127   ;;  %vm264_vm4 = vcmask 883712  }
   0x4   :  { %42 = vst [vmem:[#allocation1 + $0x20] ss:$2 sm:$0xff] %v34_v2  ;;  %v950_v19 = vld [vmem:[%s1249_s0 + $0x10] sm:$0xff]  ;;  %s845_s0 = smov 109   ;;  %vm57_vm5 = vcmask 961536   ;;  %vm355_vm6 = vcmask 744448  }
   0x5   :  { %vm400_vm7 = vcmask 736256   ;;  %vm100_vm8 = vcmask 965636   ;;  %vm446_vm9 = vcmask 1043456   ;;  %vm86_vm10 = vcmask 1039360  }
   0x6   :  { %vm442_vm11 = vcmask 293888   ;;  %vm582_vm12 = vcmask 965632  }
   0x9   :  { %v45_v3 = vld.sshfl [vmem:[#allocation1 + $0x10] sm:$0xff pattern:$0x75316420]  ;;  %v46_v4 = vld.sshfl [vmem:[#allocation1 + $0x18] sm:$0xff pattern:$0x75316420] }
   0xa   :  { %68 = vst [vmem:[#allocation1 + $0x11] ss:$2 sm:$0xff] %v907_v0  ;;  %v43_v5 = vld.sshfl [vmem:[#allocation1] sm:$0xff pattern:$0x75316420] }
   0xb   :  { %55 = vst [vmem:[#allocation2 + $0x10] sm:$0xf] %v45_v3  ;;  %v44_v6 = vld.sshfl [vmem:[#allocation1 + $0x8] sm:$0xff pattern:$0x75316420] }
   0xc   :  { %56 = vst [vmem:[#allocation2 + $0x18] sm:$0xf] %v46_v4  ;;  %v924_v8 = vld.sshfl [vmem:[#allocation1 + $0x20] sm:$0xff pattern:$0x75316420] }
   0xd   :  { %66 = vst [vmem:[#allocation1 + $0x1] ss:$2 sm:$0xff] %v912_v1 }
   0xe   :  { %53 = vst [vmem:[#allocation2] sm:$0xf] %v43_v5 }
   0xf   :  { %54 = vst [vmem:[#allocation2 + $0x8] sm:$0xf] %v44_v6 }
  0x10   :  { %70 = vst [vmem:[#allocation1 + $0x21] ss:$2 sm:$0xff] %v61_v7 }
  0x11   :  { %v926_v9 = vld.sshfl [vmem:[#allocation1 + $0x10] sm:$0xff pattern:$0x75316420]  ;;  %v928_v10 = vld.sshfl [vmem:[#allocation1 + $0x18] sm:$0xff pattern:$0x75316420] }
  0x12   :  { %110 = vst [vmem:[#allocation1 + $0x10] ss:$2 sm:$0xff] %v907_v0 }
  0x13   :  { %58 = vst.msk [vmem:[#allocation2 + $0x20] sm:$0xf] %vm57_vm5, %v924_v8 }
  0x14   :  { %v931_v11 = vld.sshfl [vmem:[#allocation1] sm:$0xff pattern:$0x75316420]  ;;  %v933_v12 = vld.sshfl [vmem:[#allocation1 + $0x8] sm:$0xff pattern:$0x75316420] }
  0x15   :  { %108 = vst [vmem:[#allocation1] ss:$2 sm:$0xff] %v912_v1 }
  0x17   :  { %v939_v14 = vld.sshfl [vmem:[#allocation1 + $0x20] sm:$0xff pattern:$0x75316420] }
  0x18   :  { %112 = vst [vmem:[#allocation1 + $0x20] ss:$2 sm:$0xff] %v104_v13 }
  0x19   :  { %v115_v15 = vld.sshfl [vmem:[#allocation1 + $0x10] sm:$0xff pattern:$0x75316420]  ;;  %v116_v16 = vld.sshfl [vmem:[#allocation1 + $0x18] sm:$0xff pattern:$0x75316420] }
  0x1a   :  { %122 = vrot.lane.b32.xlu2 %v115_v15, %s843_s19  ;;  %124 = vrot.lane.b32.xlu0 %v116_v16, %s843_s19  ;;  %152 = vst [vmem:[#allocation1 + $0x11] ss:$2 sm:$0xff] %v907_v0 }
  0x1c   :  { %v113_v17 = vld.sshfl [vmem:[#allocation1] sm:$0xff pattern:$0x75316420]  ;;  %v944_v18 = vld.sshfl [vmem:[#allocation1 + $0x8] sm:$0xff pattern:$0x75316420] }
  0x1d   :  { %150 = vst [vmem:[#allocation1 + $0x1] ss:$2 sm:$0xff] %v912_v1 }
  0x1f   :  { %v952_v20 = vld.sshfl [vmem:[#allocation1 + $0x20] sm:$0xff pattern:$0x75316420] }
  0x20   :  { %154 = vst [vmem:[#allocation1 + $0x21] ss:$2 sm:$0xff] %v950_v19 }
  0x21   :  { %v157_v21 = vld.sshfl [vmem:[#allocation1 + $0x10] sm:$0xff pattern:$0x75316420]  ;;  %v158_v22 = vld.sshfl [vmem:[#allocation1 + $0x18] sm:$0xff pattern:$0x75316420] }
  0x22   :  { %165 = vrot.lane.b32.xlu1 %v157_v21, %s844_s22  ;;  %197 = vst [vmem:[#allocation1 + $0x10] ss:$2 sm:$0xff] %v907_v0  ;;  %118 = vrot.lane.b32.xlu2 %v113_v17, %s843_s19 }
  0x24   :  { %v958_v23 = vld.sshfl [vmem:[#allocation1] sm:$0xff pattern:$0x75316420]  ;;  %v960_v24 = vld.sshfl [vmem:[#allocation1 + $0x8] sm:$0xff pattern:$0x75316420] }
  0x25   :  { %195 = vst [vmem:[#allocation1] ss:$2 sm:$0xff] %v912_v1 }
  0x27   :  { %v963_v25 = vld.sshfl [vmem:[#allocation1 + $0x20] sm:$0xff pattern:$0x75316420]  ;;  %v965_v26 = vld.sshfl [vmem:[#allocation1 + $0x28] sm:$0xff pattern:$0x75316420] }
  0x28   :  { %199 = vst [vmem:[#allocation1 + $0x20] ss:$2 sm:$0xff] %v950_v19 }
  0x29   :  { %v203_v27 = vld.sshfl [vmem:[#allocation1 + $0x18] sm:$0xff pattern:$0x75316420]  ;;  %v202_v28 = vld.sshfl [vmem:[#allocation1 + $0x10] sm:$0xff pattern:$0x75316420] }
  0x2a   :  { %210 = vrot.lane.b32.xlu1 %v202_v28, %s845_s0  ;;  %167 = vrot.lane.b32.xlu2 %v158_v22, %s844_s22  ;;  %243 = vst [vmem:[#allocation1 + $0x11] ss:$2 sm:$0xff] %v907_v0 }
  0x2c   :  { %v200_v29 = vld.sshfl [vmem:[#allocation1] sm:$0xff pattern:$0x75316420]  ;;  %v201_v30 = vld.sshfl [vmem:[#allocation1 + $0x8] sm:$0xff pattern:$0x75316420] }
  0x2d   :  { %241 = vst [vmem:[#allocation1 + $0x1] ss:$2 sm:$0xff] %v912_v1 }
  0x2f   :  { %v204_v31 = vld.sshfl [vmem:[#allocation1 + $0x20] sm:$0xff pattern:$0x75316420]  ;;  %v972_v32 = vld.sshfl [vmem:[#allocation1 + $0x28] sm:$0xff pattern:$0x75316420] }
  0x30   :  { %245 = vst [vmem:[#allocation1 + $0x21] ss:$2 sm:$0xff] %v950_v19  ;;  %214 = vrot.lane.b32.xlu0 %v204_v31, %s845_s0 }
  0x31   :  { %v248_v33 = vld.sshfl [vmem:[#allocation1 + $0x10] sm:$0xff pattern:$0x75316420]  ;;  %v249_v34 = vld.sshfl [vmem:[#allocation1 + $0x18] sm:$0xff pattern:$0x75316420] }
  0x32   :  { %212 = vrot.lane.b32.xlu2 %v203_v27, %s845_s0  ;;  %206 = vrot.lane.b32.xlu1 %v200_v29, %s845_s0  ;;  %288 = vst [vmem:[#allocation1 + $0x10] ss:$2 sm:$0xff] %v907_v0 }
  0x34   :  { %v246_v35 = vld.sshfl [vmem:[#allocation1] sm:$0xff pattern:$0x75316420]  ;;  %v247_v36 = vld.sshfl [vmem:[#allocation1 + $0x8] sm:$0xff pattern:$0x75316420] }
  0x35   :  { %286 = vst [vmem:[#allocation1] ss:$2 sm:$0xff] %v912_v1 }
  0x37   :  { %v980_v37 = vld.sshfl [vmem:[#allocation1 + $0x28] sm:$0xff pattern:$0x75316420]  ;;  %v250_v38 = vld.sshfl [vmem:[#allocation1 + $0x20] sm:$0xff pattern:$0x75316420] }
  0x38   :  { %256 = vrot.lane.b32.xlu0 %v248_v33, %s846_s23  ;;  %290 = vst [vmem:[#allocation1 + $0x20] ss:$2 sm:$0xff] %v950_v19 }
  0x39   :  { %v293_v39 = vld.sshfl [vmem:[#allocation1 + $0x10] sm:$0xff pattern:$0x75316420]  ;;  %v294_v40 = vld.sshfl [vmem:[#allocation1 + $0x18] sm:$0xff pattern:$0x75316420] }
  0x3a   :  { %208 = vrot.lane.b32.xlu2 %v201_v30, %s845_s0  ;;  %258 = vrot.lane.b32.xlu1 %v249_v34, %s846_s23  ;;  %334 = vst [vmem:[#allocation1 + $0x11] ss:$2 sm:$0xff] %v907_v0 }
  0x3c   :  { %v291_v41 = vld.sshfl [vmem:[#allocation1] sm:$0xff pattern:$0x75316420]  ;;  %v292_v42 = vld.sshfl [vmem:[#allocation1 + $0x8] sm:$0xff pattern:$0x75316420] }
  0x3d   :  { %332 = vst [vmem:[#allocation1 + $0x1] ss:$2 sm:$0xff] %v912_v1 }
  0x3f   :  { %v295_v43 = vld.sshfl [vmem:[#allocation1 + $0x20] sm:$0xff pattern:$0x75316420]  ;;  %v296_v44 = vld.sshfl [vmem:[#allocation1 + $0x28] sm:$0xff pattern:$0x75316420] }
  0x40   :  { %252 = vrot.lane.b32.xlu0 %v246_v35, %s846_s23  ;;  %336 = vst [vmem:[#allocation1 + $0x21] ss:$2 sm:$0xff] %v950_v19 }
  0x41   :  { %v339_v45 = vld.sshfl [vmem:[#allocation1 + $0x10] sm:$0xff pattern:$0x75316420]  ;;  %v340_v46 = vld.sshfl [vmem:[#allocation1 + $0x18] sm:$0xff pattern:$0x75316420] }
  0x42   :  { %301 = vrot.lane.b32.xlu2 %v293_v39, %s847_s24  ;;  %254 = vrot.lane.b32.xlu1 %v247_v36, %s846_s23  ;;  %379 = vst [vmem:[#allocation1 + $0x10] ss:$2 sm:$0xff] %v907_v0 }
  0x44   :  { %v338_v47 = vld.sshfl [vmem:[#allocation1 + $0x8] sm:$0xff pattern:$0x75316420]  ;;  %v337_v48 = vld.sshfl [vmem:[#allocation1] sm:$0xff pattern:$0x75316420] }
  0x45   :  { %377 = vst [vmem:[#allocation1] ss:$2 sm:$0xff] %v912_v1 }
  0x47   :  { %v341_v49 = vld.sshfl [vmem:[#allocation1 + $0x20] sm:$0xff pattern:$0x75316420]  ;;  %v342_v50 = vld.sshfl [vmem:[#allocation1 + $0x28] sm:$0xff pattern:$0x75316420] }
  0x48   :  { %297 = vrot.lane.b32.xlu0 %v291_v41, %s847_s24  ;;  %381 = vst [vmem:[#allocation1 + $0x20] ss:$2 sm:$0xff] %v950_v19 }
  0x49   :  { %v384_v53 = vld.sshfl [vmem:[#allocation1 + $0x10] sm:$0xff pattern:$0x75316420]  ;;  %v385_v55 = vld.sshfl [vmem:[#allocation1 + $0x18] sm:$0xff pattern:$0x75316420] }
  0x4a   :  { %303 = vrot.lane.b32.xlu2 %v294_v40, %s847_s24  ;;  %260 = vrot.lane.b32.xlu1 %v250_v38, %s846_s23 }
  0x4c   :  { %v382_v52 = vld.sshfl [vmem:[#allocation1] sm:$0xff pattern:$0x75316420]  ;;  %v383_v54 = vld.sshfl [vmem:[#allocation1 + $0x8] sm:$0xff pattern:$0x75316420] }
  0x4f   :  { %v386_v51 = vld.sshfl [vmem:[#allocation1 + $0x20] sm:$0xff pattern:$0x75316420]  ;;  %v387_v61 = vld.sshfl [vmem:[#allocation1 + $0x28] sm:$0xff pattern:$0x75316420] }
  0x50   :  { %347 = vrot.lane.b32.xlu0 %v339_v45, %s848_s25 }
  0x52   :  { %305 = vrot.lane.b32.xlu2 %v295_v43, %s847_s24  ;;  %299 = vrot.lane.b32.xlu1 %v292_v42, %s847_s24 }
  0x58   :  { %345 = vrot.lane.b32.xlu0 %v338_v47, %s848_s25 }
  0x5a   :  { %349 = vrot.lane.b32.xlu1 %v340_v46, %s848_s25  ;;  %343 = vrot.lane.b32.xlu2 %v337_v48, %s848_s25 }
  0x60   :  { %351 = vrot.lane.b32.xlu0 %v341_v49, %s848_s25 }
  0x62   :  { %396 = vrot.lane.b32.xlu2 %v386_v51, %s849_s26  ;;  %388 = vrot.lane.b32.xlu1 %v382_v52, %s849_s26 }
  0x68   :  { %392 = vrot.lane.b32.xlu0 %v384_v53, %s849_s26 }
  0x6a   :  { %163 = vrot.lane.b32.xlu2 %v960_v24, %s844_s22  ;;  %390 = vrot.lane.b32.xlu1 %v383_v54, %s849_s26 }
  0x70   :  { %394 = vrot.lane.b32.xlu0 %v385_v55, %s849_s26 }
  0x72   :  { %126 = vrot.lane.b32.xlu2 %v952_v20, %s843_s19  ;;  %161 = vrot.lane.b32.xlu1 %v958_v23, %s844_s22 }
  0x74   :  { %v1016_v56 = vpop.permute.xlu2 %122 }
  0x78   :  { %120 = vrot.lane.b32.xlu0 %v944_v18, %s843_s19 }
  0x7a   :  { %78 = vrot.lane.b32.xlu2 %v933_v12, %s850_s27  ;;  %82 = vrot.lane.b32.xlu1 %v928_v10, %s850_s27 }
  0x7c   :  { %v1022_v57 = vpop.permute.xlu2 %118 }
  0x80   :  { %80 = vrot.lane.b32.xlu0 %v926_v9, %s850_s27 }
  0x82   :  { %307 = vrot.lane.b32.xlu2 %v296_v44, %s847_s24  ;;  %76 = vrot.lane.b32.xlu1 %v931_v11, %s850_s27 }
  0x84   :  { %v1027_v58 = vpop.permute.xlu2 %167 }
  0x88   :  { %169 = vrot.lane.b32.xlu0 %v963_v25, %s844_s22 }
  0x8a   :  { %262 = vrot.lane.b32.xlu2 %v980_v37, %s846_s23  ;;  %84 = vrot.lane.b32.xlu1 %v939_v14, %s850_s27 }
  0x8c   :  { %v213_v59 = vpop.permute.xlu2 %212  ;;  %v1034_v60 = vpop.permute.xlu0 %124 }
  0x8d   :  { %v131_v62 = vsel %vm128_vm0, %v1016_v56, %v1034_v60 }
  0x8e   :  { %140 = vst [vmem:[#allocation2 + $0x38] sm:$0xf] %v131_v62 }
  0x90   :  { %398 = vrot.lane.b32.xlu0 %v387_v61, %s849_s26 }
  0x92   :  { %216 = vrot.lane.b32.xlu1 %v972_v32, %s845_s0 }
  0x94   :  { %v166_v63 = vpop.permute.xlu1 %165  ;;  %v209_v0 = vpop.permute.xlu2 %208 }
  0x95   :  { %v176_v1 = vsel %vm173_vm1, %v166_v63, %v1027_v58 }
  0x96   :  { %186 = vst [vmem:[#allocation2 + $0x38] sm:$0xf0] %v176_v1 }
  0x98   :  { %353 = vrot.lane.b32.xlu0 %v342_v50, %s848_s25 }
  0x9c   :  { %v211_v2 = vpop.permute.xlu1 %210  ;;  %v302_v3 = vpop.permute.xlu2 %301 }
  0x9d   :  { %v220_v4 = vsel %vm218_vm2, %v209_v0, %v211_v2  ;;  %v221_v5 = vsel %vm218_vm2, %v211_v2, %v213_v59 }
  0x9e   :  { %230 = vst [vmem:[#allocation2 + $0x58] sm:$0xf] %v220_v4 }
  0x9f   :  { %231 = vst [vmem:[#allocation2 + $0x60] sm:$0xf] %v221_v5 }
  0xa0   :  { %171 = vrot.lane.b32.xlu0 %v965_v26, %s844_s22 }
  0xa2   :  { %v1049_v6 = vpop.permute.xlu0 %214 }
  0xa3   :  { %v222_v7 = vsel %vm218_vm2, %v213_v59, %v1049_v6 }
  0xa4   :  { %232 = vst [vmem:[#allocation2 + $0x68] sm:$0xf] %v222_v7  ;;  %v304_v9 = vpop.permute.xlu2 %303  ;;  %v207_v10 = vpop.permute.xlu1 %206 }
  0xa5   :  { %v312_v11 = vsel %vm309_vm3, %v302_v3, %v304_v9  ;;  %v219_v12 = vsel %vm218_vm2, %v207_v10, %v209_v0 }
  0xa6   :  { %322 = vst [vmem:[#allocation2 + $0x88] sm:$0xf] %v312_v11 }
  0xa7   :  { %229 = vst [vmem:[#allocation2 + $0x50] sm:$0xf] %v219_v12 }
  0xaa   :  { %v257_v13 = vpop.permute.xlu0 %256 }
  0xac   :  { %v306_v14 = vpop.permute.xlu2 %305  ;;  %v259_v15 = vpop.permute.xlu1 %258 }
  0xad   :  { %v313_v16 = vsel %vm309_vm3, %v304_v9, %v306_v14  ;;  %v267_v17 = vsel %vm264_vm4, %v257_v13, %v259_v15 }
  0xae   :  { %323 = vst [vmem:[#allocation2 + $0x90] sm:$0xf] %v313_v16 }
  0xaf   :  { %277 = vst [vmem:[#allocation2 + $0x60] sm:$0xf0] %v267_v17 }
  0xb2   :  { %v253_v18 = vpop.permute.xlu0 %252 }
  0xb4   :  { %v255_v19 = vpop.permute.xlu1 %254  ;;  %v344_v20 = vpop.permute.xlu2 %343 }
  0xb5   :  { %v265_v21 = vsel %vm264_vm4, %v253_v18, %v255_v19  ;;  %v266_v22 = vsel %vm264_vm4, %v255_v19, %v257_v13 }
  0xb6   :  { %275 = vst [vmem:[#allocation2 + $0x50] sm:$0xf0] %v265_v21 }
  0xb7   :  { %276 = vst [vmem:[#allocation2 + $0x58] sm:$0xf0] %v266_v22  ;;  %v416_v22 = vld [vmem:[%s1250_s1] sm:$0xff] }
  0xba   :  { %v298_v23 = vpop.permute.xlu0 %297 }
  0xbc   :  { %v261_v24 = vpop.permute.xlu1 %260  ;;  %v1061_v25 = vpop.permute.xlu2 %396 }
  0xbd   :  { %v268_v26 = vsel %vm264_vm4, %v259_v15, %v261_v24  ;;  %v427_v0 = vld [vmem:[#allocation2 + $0x50] sm:$0xff] }
  0xbe   :  { %278 = vst [vmem:[#allocation2 + $0x68] sm:$0xf0] %v268_v26  ;;  %v428_v4 = vld [vmem:[#allocation2 + $0x58] sm:$0xff] }
  0xc2   :  { %v348_v27 = vpop.permute.xlu0 %347 }
  0xc4   :  { %v300_v28 = vpop.permute.xlu1 %299  ;;  %v164_v29 = vpop.permute.xlu2 %163 }
  0xc5   :  { %v310_v30 = vsel %vm309_vm3, %v298_v23, %v300_v28  ;;  %v311_v31 = vsel %vm309_vm3, %v300_v28, %v302_v3  ;;  %v175_v32 = vsel %vm173_vm1, %v164_v29, %v166_v63  ;;  %v430_v11 = vld [vmem:[#allocation2 + $0x68] sm:$0xff] }
  0xc6   :  { %320 = vst [vmem:[#allocation2 + $0x78] sm:$0xf] %v310_v30 }
  0xc7   :  { %321 = vst [vmem:[#allocation2 + $0x80] sm:$0xf] %v311_v31 }
  0xc8   :  { %185 = vst [vmem:[#allocation2 + $0x30] sm:$0xf0] %v175_v32 }
  0xca   :  { %v346_v8 = vpop.permute.xlu0 %345 }
  0xcb   :  { %v356_v33 = vsel %vm355_vm6, %v344_v20, %v346_v8  ;;  %v357_v34 = vsel %vm355_vm6, %v346_v8, %v348_v27 }
  0xcc   :  { %366 = vst [vmem:[#allocation2 + $0x78] sm:$0xf0] %v356_v33  ;;  %v350_v35 = vpop.permute.xlu1 %349  ;;  %v127_v36 = vpop.permute.xlu2 %126 }
  0xcd   :  { %367 = vst [vmem:[#allocation2 + $0x80] sm:$0xf0] %v357_v34  ;;  %v358_v37 = vsel %vm355_vm6, %v348_v27, %v350_v35  ;;  %v132_v38 = vsel %vm128_vm0, %v1034_v60, %v127_v36 }
  0xce   :  { %368 = vst [vmem:[#allocation2 + $0x88] sm:$0xf0] %v358_v37 }
  0xcf   :  { %141 = vst [vmem:[#allocation2 + $0x40] sm:$0xf] %v132_v38 }
  0xd0   :  { %142 = vst.msk [vmem:[#allocation2 + $0x48] sm:$0xf] %vm57_vm5, %v127_v36 }
  0xd2   :  { %v1073_v39 = vpop.permute.xlu0 %351 }
  0xd3   :  { %v359_v40 = vsel %vm355_vm6, %v350_v35, %v1073_v39  ;;  %v432_v61 = vld [vmem:[#allocation2 + $0x78] sm:$0xff] }
  0xd4   :  { %369 = vst [vmem:[#allocation2 + $0x90] sm:$0xf0] %v359_v40  ;;  %v1077_v41 = vpop.permute.xlu2 %78  ;;  %v389_v42 = vpop.permute.xlu1 %388  ;;  %v433_v62 = vld [vmem:[#allocation2 + $0x80] sm:$0xff] }
  0xd5   :  { %v434_v9 = vld [vmem:[#allocation2 + $0x88] sm:$0xff] }
  0xda   :  { %v393_v43 = vpop.permute.xlu0 %392 }
  0xdb   :  { %v435_v10 = vld [vmem:[#allocation2 + $0x90] sm:$0xff] }
  0xdc   :  { %v308_v44 = vpop.permute.xlu2 %307  ;;  %v391_v45 = vpop.permute.xlu1 %390 }
  0xdd   :  { %v314_v46 = vsel %vm309_vm3, %v306_v14, %v308_v44  ;;  %v401_v47 = vsel %vm400_vm7, %v389_v42, %v391_v45  ;;  %v402_v48 = vsel %vm400_vm7, %v391_v45, %v393_v43  ;;  %vm679_vm3 = vcmask 15368  }
  0xde   :  { %324 = vst.msk [vmem:[#allocation2 + $0x98] sm:$0xf] %vm57_vm5, %v314_v46 }
  0xdf   :  { %411 = vst [vmem:[#allocation2 + $0xa0] sm:$0xf] %v401_v47 }
  0xe0   :  { %412 = vst [vmem:[#allocation2 + $0xa8] sm:$0xf] %v402_v48 }
  0xe2   :  { %v395_v49 = vpop.permute.xlu0 %394 }
  0xe3   :  { %v403_v50 = vsel %vm400_vm7, %v393_v43, %v395_v49  ;;  %v404_v51 = vsel %vm400_vm7, %v395_v49, %v1061_v25 }
  0xe4   :  { %413 = vst [vmem:[#allocation2 + $0xb0] sm:$0xf] %v403_v50  ;;  %v263_v52 = vpop.permute.xlu2 %262  ;;  %v162_v53 = vpop.permute.xlu1 %161 }
  0xe5   :  { %414 = vst [vmem:[#allocation2 + $0xb8] sm:$0xf] %v404_v51  ;;  %v269_v54 = vsel %vm264_vm4, %v261_v24, %v263_v52  ;;  %v174_v55 = vsel %vm173_vm1, %v162_v53, %v164_v29  ;;  %vm689_vm4 = vcmask 64512  }
  0xe6   :  { %279 = vst.msk [vmem:[#allocation2 + $0x70] sm:$0xf0] %vm100_vm8, %v269_v54  ;;  %v437_v59 = vld [vmem:[#allocation2 + $0xa0] sm:$0xf] }
  0xe7   :  { %184 = vst [vmem:[#allocation2 + $0x28] sm:$0xf0] %v174_v55  ;;  %807 = vmatpush.msk.msra.mxu0 %vm446_vm9, %v437_v59  ;;  %v438_v60 = vld [vmem:[#allocation2 + $0xa8] sm:$0xf] }
  0xe8   :  { %809 = vmatpush.msk.msra.mxu1 %vm446_vm9, %v438_v60 }
  0xe9   :  { %474 = vmatpush.msra.mxu0 %v432_v61 }
  0xea   :  { %v121_v63 = vpop.permute.xlu0 %120  ;;  %494 = vmatpush.msra.mxu1 %v433_v62 }
  0xeb   :  { %v129_v1 = vsel %vm128_vm0, %v1022_v57, %v121_v63  ;;  %v130_v2 = vsel %vm128_vm0, %v121_v63, %v1016_v56  ;;  %v439_v3 = vld [vmem:[#allocation2 + $0xb0] sm:$0xf]  ;;  %475 = vmatpush.msra.mxu0 %v427_v0  ;;  %v429_v57 = vld [vmem:[#allocation2 + $0x60] sm:$0xff]  ;;  %v424_v56 = vld [vmem:[#allocation2 + $0x38] sm:$0xff]  ;;  %vm650_vm0 = vcmask 261120  }
  0xec   :  { %138 = vst [vmem:[#allocation2 + $0x28] sm:$0xf] %v129_v1  ;;  %811 = vmatpush.msk.msra.mxu2 %vm446_vm9, %v439_v3  ;;  %v440_v5 = vld [vmem:[#allocation2 + $0xb8] sm:$0xf]  ;;  %495 = vmatpush.msra.mxu1 %v428_v4  ;;  %v83_v7 = vpop.permute.xlu1 %82 }
  0xed   :  { %139 = vst [vmem:[#allocation2 + $0x30] sm:$0xf] %v130_v2  ;;  %813 = vmatpush.msk.msra.mxu3 %vm446_vm9, %v440_v5 }
  0xee   :  { %514 = vmatpush.msra.mxu2 %v434_v9 }
  0xef   :  { %534 = vmatpush.msra.mxu3 %v435_v10 }
  0xf0   :  { %515 = vmatpush.msra.mxu2 %v429_v57  ;;  %v851_v57 = vmov 0  }
  0xf1   :  { %535 = vmatpush.msra.mxu3 %v430_v11  ;;  %832 = vset.pattern.permute.xlu0 %v851_v57 }
  0xf2   :  { %516 = vmatpush.msra.mxu2 %v424_v56  ;;  %v81_v12 = vpop.permute.xlu0 %80  ;;  %833 = vset.pattern.permute.xlu1 %v851_v57 }
  0xf3   :  { %v88_v13 = vsel %vm86_vm10, %v1077_v41, %v81_v12  ;;  %v89_v14 = vsel %vm86_vm10, %v81_v12, %v83_v7  ;;  %v422_v15 = vld [vmem:[#allocation2 + $0x28] sm:$0xff]  ;;  %834 = vset.pattern.permute.xlu2 %v851_v57 }
  0xf4   :  { %97 = vst [vmem:[#allocation2 + $0x8] sm:$0xf0] %v88_v13  ;;  %476 = vmatpush.msra.mxu0 %v422_v15  ;;  %v423_v16 = vld [vmem:[#allocation2 + $0x30] sm:$0xff]  ;;  %v77_v17 = vpop.permute.xlu1 %76 }
  0xf5   :  { %98 = vst [vmem:[#allocation2 + $0x10] sm:$0xf0] %v89_v14  ;;  %496 = vmatpush.msra.mxu1 %v423_v16  ;;  %v87_v18 = vsel %vm86_vm10, %v77_v17, %v1077_v41 }
  0xf6   :  { %96 = vst [vmem:[#allocation2] sm:$0xf0] %v87_v18 }
  0xfa   :  { %v170_v19 = vpop.permute.xlu0 %169 }
  0xfb   :  { %v177_v20 = vsel %vm173_vm1, %v1027_v58, %v170_v19  ;;  %v418_v21 = vld [vmem:[#allocation2 + $0x8] sm:$0xff] }
  0xfc   :  { %187 = vst [vmem:[#allocation2 + $0x40] sm:$0xf0] %v177_v20  ;;  %497 = vmatpush.msra.mxu1 %v418_v21  ;;  %v419_v23 = vld [vmem:[#allocation2 + $0x10] sm:$0xff]  ;;  %v85_v24 = vpop.permute.xlu1 %84 }
  0xfd   :  { %517 = vmatpush.msra.mxu2 %v419_v23  ;;  %v90_v26 = vsel %vm86_vm10, %v83_v7, %v85_v24  ;;  %101 = vst.msk [vmem:[#allocation2 + $0x20] sm:$0xf0] %vm100_vm8, %v85_v24  ;;  %v417_v27 = vld [vmem:[#allocation2] sm:$0xff]  ;;  %810 = vmatmul.msk.f32.vlgmr.msra.gmra.mxu1 %vm442_vm11, %v416_v22 }
  0xfe   :  { %99 = vst [vmem:[#allocation2 + $0x18] sm:$0xf0] %v90_v26  ;;  %477 = vmatpush.msra.mxu0 %v417_v27  ;;  %812 = vmatmul.msk.f32.vlgmr.msra.gmra.mxu2 %vm442_vm11, %v416_v22 }
  0xff   :  { %808 = vmatmul.msk.f32.vlgmr.msra.gmra.mxu0 %vm442_vm11, %v416_v22 }
 0x102   :  { %v399_v58 = vpop.permute.xlu0 %398 }
 0x103   :  { %v405_v28 = vsel %vm400_vm7, %v1061_v25, %v399_v58  ;;  %v425_v29 = vld [vmem:[#allocation2 + $0x40] sm:$0xff]  ;;  %v616_v58 = vld [vmem:[%s1253_s4] sm:$0xff] }
 0x104   :  { %415 = vst.msk [vmem:[#allocation2 + $0xc0] sm:$0xf] %vm57_vm5, %v405_v28  ;;  %536 = vmatpush.msra.mxu3 %v425_v29  ;;  %v217_v30 = vpop.permute.xlu1 %216  ;;  %v421_v38 = vld [vmem:[#allocation2 + $0x20] sm:$0xff] }
 0x105   :  { %v223_v31 = vsel %vm218_vm2, %v1049_v6, %v217_v30  ;;  %v420_v32 = vld [vmem:[#allocation2 + $0x18] sm:$0xff]  ;;  %vm667_vm2 = vcmask 343040  }
 0x106   :  { %233 = vst.msk [vmem:[#allocation2 + $0x70] sm:$0xf] %vm57_vm5, %v223_v31  ;;  %537 = vmatpush.msra.mxu3 %v420_v32  ;;  %vm725_vm5 = vcmask 1041408  }
 0x107   :  { %814 = vmatmul.msk.f32.vlgmr.msra.gmra.mxu3 %vm442_vm11, %v416_v22 }
 0x10a   :  { %v354_v8 = vpop.permute.xlu0 %353 }
 0x10b   :  { %v360_v33 = vsel %vm355_vm6, %v1073_v39, %v354_v8  ;;  %v441_v34 = vld [vmem:[#allocation2 + $0xc0] sm:$0xf]  ;;  %v1129_v39 = vld [vmem:[%s1251_s2] sm:$0x1f]  ;;  %vm721_vm6 = vcmask 15360  }
 0x10c   :  { %370 = vst.msk [vmem:[#allocation2 + $0x98] sm:$0xf0] %vm100_vm8, %v360_v33  ;;  %815 = vmatpush.msk.msrb.mxu0 %vm446_vm9, %v441_v34  ;;  %v564_v40 = vperm.slane %v1129_v39, 0  ;;  %v565_v41 = vperm.slane %v1129_v39, 1  ;;  %v566_v46 = vperm.slane %v1129_v39, 2  ;;  %v567_v51 = vperm.slane %v1129_v39, 3 }
 0x10d   :  { %v431_v6 = vld [vmem:[#allocation2 + $0x70] sm:$0xff]  ;;  %v568_v60 = vperm.slane %v1129_v39, 4 }
 0x112   :  { %v172_v25 = vpop.permute.xlu0 %171 }
 0x113   :  { %v178_v35 = vsel %vm173_vm1, %v170_v19, %v172_v25  ;;  %v436_v36 = vld [vmem:[#allocation2 + $0x98] sm:$0xff]  ;;  %vm656_vm1 = vcmask 7168  }
 0x114   :  { %188 = vst.msk [vmem:[#allocation2 + $0x48] sm:$0xf0] %vm100_vm8, %v178_v35  ;;  %554 = vmatpush.msrb.mxu0 %v436_v36 }
 0x116   :  { %555 = vmatpush.msrb.mxu0 %v431_v6 }
 0x11b   :  { %v426_v37 = vld [vmem:[#allocation2 + $0x48] sm:$0xff] }
 0x11c   :  { %556 = vmatpush.msrb.mxu0 %v426_v37 }
 0x11e   :  { %557 = vmatpush.msrb.mxu0 %v421_v38 }
 0x11f   :  { %816 = vmatmul.msk.f32.vlgmr.msrb.gmra.mxu0 %vm442_vm11, %v416_v22  ;;  %v603_v22 = vld [vmem:[%s1252_s3] sm:$0xff]  ;;  %s852_s3 = smov 42  }
 0x17a   :  { %v1135_v43 = vpop.f32.mrf.mxu1 }
 0x17b   :  { %v575_v45 = vmul.f32 %v565_v41, %v1135_v43 }
 0x17c   :  { %v1133_v42 = vpop.f32.mrf.mxu0 }
 0x17d   :  { %v574_v44 = vmul.f32 %v564_v40, %v1133_v42  ;;  %v589_v49 = vmul.f32 %v575_v45, %v1135_v43 }
 0x17f   :  { %v588_v48 = vmul.f32 %v574_v44, %v1133_v42  ;;  %v579_v53 = vadd.f32 %v575_v45, %v574_v44 }
 0x181   :  { %v519_v47 = vpop.f32.mrf.mxu2  ;;  %v593_v54 = vadd.f32 %v589_v49, %v588_v48 }
 0x182   :  { %v576_v50 = vmul.f32 %v566_v46, %v519_v47 }
 0x184   :  { %v590_v55 = vmul.f32 %v576_v50, %v519_v47  ;;  %v580_v61 = vadd.f32 %v579_v53, %v576_v50 }
 0x186   :  { %v594_v0 = vadd.f32 %v593_v54, %v590_v55 }
 0x18a   :  { %v539_v52 = vpop.f32.mrf.mxu3 }
 0x18b   :  { %v577_v59 = vmul.f32 %v567_v51, %v539_v52 }
 0x18d   :  { %v591_v62 = vmul.f32 %v577_v59, %v539_v52  ;;  %v581_v2 = vadd.f32 %v580_v61, %v577_v59 }
 0x18f   :  { %v595_v7 = vadd.f32 %v594_v0, %v591_v62 }
 0x19c   :  { %v559_v63 = vpop.f32.mrf.mxu0 }
 0x19d   :  { %v578_v1 = vmul.f32 %v568_v60, %v559_v63 }
 0x19f   :  { %v592_v3 = vmul.f32 %v578_v1, %v559_v63  ;;  %v583_v4 = vsel %vm582_vm12, %v578_v1, 0.0 }
 0x1a0   :  { %v584_v5 = vadd.f32 %v583_v4, %v581_v2 }
 0x1a1   :  { %v596_v9 = vsel %vm582_vm12, %v592_v3, 0.0  ;;  %v681_v3 = vld [vmem:[%s1255_s5] sm:$0x3] }
 0x1a2   :  { %585 = vadd.xlane.f32.xlu1 %v584_v5  ;;  %v597_v10 = vadd.f32 %v596_v9, %v595_v7  ;;  %v715_v5 = vld [vmem:[%s1256_s8] sm:$0xff] }
 0x1a4   :  { %598 = vadd.xlane.f32.xlu2 %v597_v10 }
 0x215   :  { %v586_v11 = vpop.xlane.xlu1 %585 }
 0x216   :  { %v587_v56 = vmul.f32 0.001953125, %v586_v11  ;;  %v714_v11 = vld [vmem:[%s1257_s7] sm:$0xff] }
 0x217   :  { %v599_v12 = vpop.xlane.xlu2 %598 }
 0x218   :  { %v601_v13 = vmul.f32 %v587_v56, %v587_v56  ;;  %v600_v14 = vmul.f32 0.001953125, %v599_v12 }
 0x21a   :  { %v602_v15 = vsub.f32 %v600_v14, %v601_v13 }
 0x21c   :  { %v604_v16 = vadd.f32 1e-05, %v602_v15 }
 0x21e   :  { %837 = vrsqrt.f32 %v604_v16  ;;  %vm611_vm14 = vweird.f32 %v604_v16 }
 0x224   :  { %v838_v17 = vpop.eup %837 }
 0x225   :  { %v606_v18 = vmul.f32 %v838_v17, %v604_v16  ;;  %vm612_vm13 = vweird.f32 %v838_v17 }
 0x226   :  { %vm613_vm15 = vmor %vm611_vm14, %vm612_vm13 }
 0x227   :  { %v607_v19 = vmul.f32 %v838_v17, %v606_v18 }
 0x229   :  { %v608_v20 = vmul.f32 0.5, %v607_v19 }
 0x22b   :  { %v609_v21 = vsub.f32 1.5, %v608_v20 }
 0x22d   :  { %v610_v23 = vmul.f32 %v838_v17, %v609_v21 }
 0x22f   :  { %v614_v24 = vsel %vm613_vm15, %v838_v17, %v610_v23 }
 0x230   :  { %v615_v26 = vmul.f32 %v614_v24, %v603_v22 }
 0x232   :  { %621 = vperm.xlu0 %832, %v615_v26   ;;  %v617_v27 = vmul.f32 %v615_v26, %v587_v56  ;;  %v853_v56 = vmov 1  }
 0x234   :  { %v618_v28 = vsub.f32 %v616_v58, %v617_v27 }
 0x23a   :  { %631 = vperm.xlu0 %832, %v618_v28  }
 0x242   :  { %836 = vset.pattern.permute.xlu0 %v853_v56 }
 0x2a4   :  { %v622_v29 = vpop.permute.xlu0 %621 }
 0x2a5   :  { %v624_v30 = vmul.f32 %v622_v29, %v1133_v42  ;;  %v625_v31 = vmul.f32 %v622_v29, %v1135_v43  ;;  %v626_v32 = vmul.f32 %v622_v29, %v519_v47  ;;  %v628_v8 = vmul.f32 %v622_v29, %v559_v63 }
 0x2a6   :  { %v627_v6 = vmul.f32 %v622_v29, %v539_v52 }
 0x2ac   :  { %v632_v33 = vpop.permute.xlu0 %631 }
 0x2ad   :  { %v636_v34 = vadd.f32 %v632_v33, %v626_v32  ;;  %v1162_v25 = vadd.f32 %v632_v33, %v628_v8  ;;  %v1164_v35 = vadd.f32 %v632_v33, %v624_v30  ;;  %v1166_v36 = vadd.f32 %v632_v33, %v625_v31 }
 0x2ae   :  { %v1173_v43 = vadd.f32 %v632_v33, %v627_v6 }
 0x2af   :  { %v643_v37 = vmax.f32 %v1162_v25, 0.0  ;;  %v1169_v38 = vmax.f32 %v636_v34, 0.0  ;;  %v639_v44 = vmax.f32 %v1164_v35, 0.0  ;;  %v640_v42 = vmax.f32 %v1166_v36, 0.0 }
 0x2b1   :  { %v648_v45 = vmul.f32 %v643_v37, %v568_v60  ;;  %v646_v47 = vmul.f32 %v1169_v38, %v566_v46  ;;  %v644_v48 = vmul.f32 %v639_v44, %v564_v40  ;;  %v645_v49 = vmul.f32 %v640_v42, %v565_v41 }
 0x2b2   :  { %v642_v46 = vmax.f32 %v1173_v43, 0.0 }
 0x2b3   :  { %665 = vrot.lane.b32.xlu2 %v648_v45, %s852_s3  ;;  %661 = vrot.lane.b32.xlu0 %v646_v47, %s852_s3  ;;  %v649_v50 = vadd.f32 %v645_v49, %v644_v48  ;;  %v651_v52 = vsel %vm650_vm0, %v646_v47, 0.0 }
 0x2b4   :  { %v647_v40 = vmul.f32 %v642_v46, %v567_v51  ;;  %v683_v51 = vld [vmem:[%s1254_s6] sm:$0x3] }
 0x2b5   :  { %v652_v53 = vadd.f32 %v651_v52, %v649_v50 }
 0x2b7   :  { %653 = vadd.xlane.f32.xlu1 %v652_v53 }
 0x2bb   :  { %663 = vrot.lane.b32.xlu0 %v647_v40, %s852_s3  ;;  %718 = vperm.xlu2 %834, %v715_v5  }
 0x2c3   :  { %835 = vset.pattern.permute.xlu2 %v853_v56 }
 0x2d0   :  { %686 = vperm.xlu1 %833, %v683_v51  }
 0x30d   :  { %v666_v59 = vpop.permute.xlu2 %665 }
 0x30e   :  { %v674_v39 = vsel %vm650_vm0, %v666_v59, 0.0 }
 0x315   :  { %v719_v12 = vpop.permute.xlu2 %718 }
 0x325   :  { %v662_v41 = vpop.permute.xlu0 %661 }
 0x32a   :  { %v654_v54 = vpop.xlane.xlu1 %653 }
 0x32b   :  { %v655_v55 = vmul.f32 0.00390625, %v654_v54 }
 0x32d   :  { %657 = vst.msk [vmem:[#allocation3] sm:$0xff] %vm656_vm1, %v655_v55  ;;  %v664_v60 = vpop.permute.xlu0 %663 }
 0x32e   :  { %v668_v61 = vsel %vm667_vm2, %v662_v41, %v664_v60  ;;  %v669_v62 = vsel %vm667_vm2, %v664_v60, %v666_v59 }
 0x32f   :  { %v673_v63 = vadd.f32 %v669_v62, %v668_v61 }
 0x331   :  { %v675_v0 = vadd.f32 %v674_v39, %v673_v63 }
 0x333   :  { %676 = vadd.xlane.f32.xlu0 %v675_v0 }
 0x342   :  { %v687_v7 = vpop.permute.xlu1 %686 }
 0x3a6   :  { %v677_v1 = vpop.xlane.xlu0 %676 }
 0x3a7   :  { %v678_v2 = vmul.f32 0.00390625, %v677_v1 }
 0x3a9   :  { %680 = vst.msk [vmem:[#allocation3] sm:$0xff] %vm679_vm3, %v678_v2 }
 0x3b0   :  { %v682_v4 = vld [vmem:[#allocation3] sm:$0xff] }
 0x3b1   :  { %708 = vmatpush.msrb.mxu1 %v682_v4 }
 0x3b2   :  { %817 = vmatmul.msk.f32.vlgmr.msrb.gmra.mxu1 %vm689_vm4, %v681_v3 }
 0x42f   :  { %v710_v9 = vpop.f32.mrf.mxu1 }
 0x430   :  { %v711_v10 = vadd.f32 %v710_v9, %v687_v7 }
 0x432   :  { %v713_v57 = vmax.f32 %v711_v10, 0.0 }
 0x434   :  { %818 = vmatpush.msk.msrb.mxu2 %vm725_vm5, %v713_v57 }
 0x435   :  { %819 = vmatmul.msk.f32.vlgmr.msrb.gmra.mxu2 %vm721_vm6, %v714_v11 }
 0x4b8   :  { %v746_v13 = vpop.f32.mrf.mxu2 }
 0x4b9   :  { %v747_v14 = vadd.f32 %v746_v13, %v719_v12 }
 0x4bb   :  { %v820_v15 = vmul.f32 -1.442695, %v747_v14 }
 0x4bd   :  { %839 = vpow2.f32 %v820_v15 }
 0x4c3   :  { %v840_v16 = vpop.eup %839 }
 0x4c4   :  { %v752_v17 = vadd.f32 1.0, %v840_v16 }
 0x4c6   :  { %841 = vrcp.f32 %v752_v17  ;;  %v764_v21 = vand.u32 2147483648, %v752_v17  ;;  %v762_v23 = vand.u32 2147483647, %v752_v17  ;;  %vm758_vm8 = vweird.f32 %v752_v17 }
 0x4c8   :  { %v765_v26 = vor.u32 1.1754944e-38, %v764_v21  ;;  %vm763_vm10 = vcmp.eq.f32.partialorder %v762_v23, 8.507059e+37 }
 0x4cc   :  { %v842_v18 = vpop.eup %841 }
 0x4cd   :  { %v754_v19 = vmul.f32 %v842_v18, %v752_v17  ;;  %vm759_vm7 = vweird.f32 %v842_v18 }
 0x4ce   :  { %vm760_vm9 = vmor %vm758_vm8, %vm759_vm7 }
 0x4cf   :  { %v755_v20 = vsub.f32 1.0, %v754_v19 }
 0x4d1   :  { %v756_v22 = vmul.f32 %v842_v18, %v755_v20 }
 0x4d3   :  { %v757_v24 = vadd.f32 %v842_v18, %v756_v22 }
 0x4d5   :  { %v761_v27 = vsel %vm760_vm9, %v842_v18, %v757_v24 }
 0x4d6   :  { %v766_v58 = vsel %vm763_vm10, %v765_v26, %v761_v27 }
 0x4d7   :  { %770 = vperm.xlu1 %833, %v766_v58   ;;  %780 = vperm.xlu2 %835, %v766_v58  }
 0x531   :  { %v781_v28 = vpop.permute.xlu2 %780 }
 0x532   :  { %v783_v29 = vmul.f32 %v781_v28, %v1169_v38  ;;  %v784_v30 = vmul.f32 %v781_v28, %v642_v46  ;;  %v785_v31 = vmul.f32 %v781_v28, %v643_v37 }
 0x534   :  { %791 = vrot.lane.b32.xlu1 %v784_v30, %s852_s3  ;;  %789 = vrot.lane.b32.xlu2 %v783_v29, %s852_s3 }
 0x53c   :  { %793 = vrot.lane.b32.xlu2 %v785_v31, %s852_s3 }
 0x549   :  { %v771_v32 = vpop.permute.xlu1 %770 }
 0x54a   :  { %v773_v8 = vmul.f32 %v771_v32, %v639_v44  ;;  %v774_v33 = vmul.f32 %v771_v32, %v640_v42  ;;  %v775_v34 = vmul.f32 %v771_v32, %v1169_v38 }
 0x54c   :  { %776 = vst [vmem:[%s1258_s9] sm:$0xff] %v773_v8 }
 0x54d   :  { %777 = vst [vmem:[%s1258_s9 + $0x8] sm:$0xff] %v774_v33 }
 0x54e   :  { %778 = vst.msk [vmem:[%s1258_s9 + $0x10] sm:$0xff] %vm650_vm0, %v775_v34 }
 0x58e   :  { %v790_v25 = vpop.permute.xlu2 %789 }
 0x596   :  { %v794_v35 = vpop.permute.xlu2 %793 }
 0x597   :  { %802 = vst.msk [vmem:[%s1258_s9 + $0x28] sm:$0xff] %vm650_vm0, %v794_v35 }
 0x5a6   :  { %v792_v36 = vpop.permute.xlu1 %791 }
 0x5a7   :  { %v795_v6 = vsel %vm667_vm2, %v790_v25, %v792_v36  ;;  %v796_v37 = vsel %vm667_vm2, %v792_v36, %v794_v35 }
 0x5a8   :  { %800 = vst [vmem:[%s1258_s9 + $0x18] sm:$0xff] %v795_v6 }
 0x5a9   :  { %801 = vst [vmem:[%s1258_s9 + $0x20] sm:$0xff] %v796_v37 }

</bundles_post_ra>
